<compile_context>
chip_gen: v7x
topology: tpu7x:2x2x1
jax: 0.10.0
libtpu: 0.0.40
codegen_flags: <defaults>
</compile_context>

<pallas_src>
import functools

import jax
import jax.numpy as jnp
from jax import lax
from jax.experimental import pallas as pl
from jax.experimental.pallas import tpu as pltpu


# ---------------------------------------------------------------------------
# helpers
# ---------------------------------------------------------------------------
def _vmem_budget_bytes():
    """Generation-aware scoped-VMEM budget for these kernels."""
    try:
        cap = int(pltpu.get_tpu_info().vmem_capacity_bytes)
    except Exception:  # interpret mode / older jax: be conservative (v7x-sized)
        cap = 64 << 20
    return max(16 << 20, min(cap // 2, 64 << 20))


def _padded_bytes(c, l, itemsize):
    """VMEM footprint of one (c, l) tile after (sublane, lane) padding."""
    sub_mult = max(8, 32 // itemsize)          # 8 for f32, 16 for bf16, 32 for int8
    sub = -(-c // sub_mult) * sub_mult
    lane = -(-l // 128) * 128
    return sub * lane * itemsize


def _largest_divisor_leq(n, cap):
    cap = max(1, min(n, cap))
    for d in range(cap, 0, -1):
        if n % d == 0:
            return d
    return 1


def _lane_partial_sum(xt):
    """Fold the trailing (lane) axis down to <=128 lanes with pure VPU adds.
    128-aligned static slices are cheap vreg-group views (no XLU work)."""
    bl = xt.shape[-1]
    if bl <= 128 or bl % 128 != 0:
        return xt
    part = xt[..., 0:128]
    for j in range(1, bl // 128):
        part = part + xt[..., j * 128:(j + 1) * 128]
    return part


def _pick_block_l(L, C, itemsize, target_bytes):
    """L-tile for the two-pass path: a multiple of 128 keeping one (1, C, bL)
    block near target_bytes; prefers bL | L (no masking), otherwise the last
    partial tile is masked in-kernel (avoids a whole-L block blowing VMEM)."""
    if L <= 128:
        return L
    cap = max(128, (target_bytes // max(1, C * itemsize)) // 128 * 128)
    if cap >= L:
        return L
    if L % 128 == 0:
        bl = cap
        while bl > 128 and L % bl != 0:
            bl -= 128
        if L % bl == 0:
            return bl
    return cap   # multiple of 128; last tile is partial and masked


# ---------------------------------------------------------------------------
# Fused kernel: pool -> MLP -> sigmoid -> scale in one pass over x.
# ---------------------------------------------------------------------------
def _se_fused_kernel(x_ref, w1_ref, b1_ref, w2_ref, b2_ref, o_ref, *, inv_l):
    xt = x_ref[...].astype(jnp.float32)                             # (bB, C, L)
    pooled = jnp.sum(_lane_partial_sum(xt), axis=-1) * inv_l        # (bB, C)
    h = jnp.dot(pooled, w1_ref[...],
                preferred_element_type=jnp.float32) + b1_ref[...]   # (bB, H)
    h = jnp.maximum(h, 0.0)
    z = jnp.dot(h, w2_ref[...],
                preferred_element_type=jnp.float32) + b2_ref[...]   # (bB, C)
    s = jax.nn.sigmoid(z)                                           # (bB, C)
    o_ref[...] = (xt * s[:, :, None]).astype(o_ref.dtype)


# ---------------------------------------------------------------------------
# Fallback pass 1: tiled mean over L with a lane-resident accumulator.
# ---------------------------------------------------------------------------
def _se_pool_kernel(x_ref, pool_ref, acc_ref, *, inv_l, total_l, needs_mask):
    l = pl.program_id(1)

    @pl.when(l == 0)
    def _init():
        acc_ref[...] = jnp.zeros_like(acc_ref)

    xt = x_ref[...].astype(jnp.float32)                             # (1, C, bL)
    if needs_mask:  # partial last L tile: zero the out-of-range lanes
        pos = lax.broadcasted_iota(jnp.int32, xt.shape, 2) + l * xt.shape[-1]
        xt = jnp.where(pos < total_l, xt, 0.0)
    acc_ref[...] += _lane_partial_sum(xt)                           # VPU only

    @pl.when(l == pl.num_programs(1) - 1)
    def _finalize():  # single cross-lane (XLU) reduce per batch
        pool_ref[...] = jnp.sum(acc_ref[...], axis=-1, keepdims=True) * inv_l


# ---------------------------------------------------------------------------
# Fallback pass 2: channel-wise rescale (one f32 multiply per element).
# ---------------------------------------------------------------------------
def _se_scale_kernel(x_ref, s_ref, o_ref):
    o_ref[...] = (x_ref[...] * s_ref[...]).astype(o_ref.dtype)


# ---------------------------------------------------------------------------
# Wrapper
# ---------------------------------------------------------------------------
def se_block(x, w1, b1, w2, b2, *, force_two_pass=False, max_block_bytes=None):
    """x: (B, C, L); w1: (H, C) torch Linear layout; b1: (H,); w2: (C, H); b2: (C,)."""
    B, C, L = x.shape
    H = w1.shape[0]
    itemsize = jnp.dtype(x.dtype).itemsize

    budget = _vmem_budget_bytes()
    target = max_block_bytes if max_block_bytes is not None else min(4 << 20, budget // 8)

    # Torch Linear weights are (out, in); pre-transpose so kernels do plain dots.
    w1_t = jnp.transpose(w1).astype(jnp.float32)     # (C, H)
    w2_t = jnp.transpose(w2).astype(jnp.float32)     # (H, C)
    b1_2d = b1.reshape(1, H).astype(jnp.float32)
    b2_2d = b2.reshape(1, C).astype(jnp.float32)

    # Rough per-batch VMEM cost of the fused kernel: double-buffered input and
    # output blocks plus the f32 working copy, with (sublane, lane) padding.
    slab_store = _padded_bytes(C, L, itemsize)
    slab_f32 = _padded_bytes(C, L, 4)
    per_batch = 4 * slab_store + 2 * slab_f32
    use_fused = (not force_two_pass) and per_batch <= budget

    if use_fused:
        # Size the batch block by bytes; keep >= 2 grid steps when B >= 2 so a
        # v7x chip can shard the (parallel) batch axis across both TensorCores.
        max_bb = max(1, min(budget // per_batch, target // max(1, slab_store)))
        if B >= 2:
            max_bb = min(max_bb, max(1, B // 2))
        bB = _largest_divisor_leq(B, max_bb)
        nB = B // bB

        x_spec = pl.BlockSpec((bB, C, L), lambda b: (b, 0, 0))
        return pl.pallas_call(
            functools.partial(_se_fused_kernel, inv_l=1.0 / L),
            out_shape=jax.ShapeDtypeStruct((B, C, L), x.dtype),
            grid=(nB,),
            in_specs=[
                x_spec,
                pl.BlockSpec((C, H), lambda b: (0, 0)),
                pl.BlockSpec((1, H), lambda b: (0, 0)),
                pl.BlockSpec((H, C), lambda b: (0, 0)),
                pl.BlockSpec((1, C), lambda b: (0, 0)),
            ],
            out_specs=x_spec,
            compiler_params=pltpu.CompilerParams(
                dimension_semantics=("parallel",),
                vmem_limit_bytes=budget),
        )(x, w1_t, b1_2d, w2_t, b2_2d)

    # ---- fallback: two passes over x (per-batch slab too large for VMEM) ----
    # TODO(synk): for huge C with tiny L the (1, C, bL) block itself may not
    # fit VMEM; that case additionally needs C tiling.
    # TODO(synk): on v7x with B == 1, pass 1 runs on a single TensorCore; a
    # second parallel axis splitting the L range would use both cores.
    bL = _pick_block_l(L, C, itemsize, target)
    nL = pl.cdiv(L, bL)
    needs_mask = (L % bL) != 0
    acc_w = 128 if bL % 128 == 0 else bL

    pooled = pl.pallas_call(
        functools.partial(_se_pool_kernel, inv_l=1.0 / L, total_l=L,
                          needs_mask=needs_mask),
        out_shape=jax.ShapeDtypeStruct((B, C, 1), jnp.float32),
        grid=(B, nL),
        in_specs=[pl.BlockSpec((1, C, bL), lambda b, l: (b, 0, l))],
        out_specs=pl.BlockSpec((1, C, 1), lambda b, l: (b, 0, 0)),
        scratch_shapes=[pltpu.VMEM((1, C, acc_w), jnp.float32)],
        compiler_params=pltpu.CompilerParams(
            dimension_semantics=("parallel", "arbitrary"),
            vmem_limit_bytes=budget),
    )(x)

    # Tiny excitation MLP stays in plain XLA (off the critical path).
    pooled2 = pooled.reshape(B, C)
    h = jnp.maximum(pooled2 @ w1_t + b1_2d, 0.0)
    gates = jax.nn.sigmoid(h @ w2_t + b2_2d).astype(jnp.float32).reshape(B, C, 1)

    return pl.pallas_call(
        _se_scale_kernel,
        out_shape=jax.ShapeDtypeStruct((B, C, L), x.dtype),
        grid=(B, nL),
        in_specs=[
            pl.BlockSpec((1, C, bL), lambda b, l: (b, 0, l)),
            pl.BlockSpec((1, C, 1), lambda b, l: (b, 0, 0)),
        ],
        out_specs=pl.BlockSpec((1, C, bL), lambda b, l: (b, 0, l)),
        compiler_params=pltpu.CompilerParams(
            dimension_semantics=("parallel", "parallel"),
            vmem_limit_bytes=budget),
    )(x, gates)


def se_block_ref(x, w1, b1, w2, b2):
    """Pure-JAX reference matching the PyTorch forward."""
    pooled = jnp.mean(x.astype(jnp.float32), axis=-1)                  # (B, C)
    h = jnp.maximum(pooled @ w1.T.astype(jnp.float32) + b1, 0.0)       # (B, H)
    s = jax.nn.sigmoid(h @ w2.T.astype(jnp.float32) + b2)              # (B, C)
    return (x.astype(jnp.float32) * s[:, :, None]).astype(x.dtype)


if __name__ == "__main__":
    # SEBlock(channels=32, reduction=16) -> hidden = 32 // 16 = 2
    B, C, L = 2, 32, 16
    reduction = 16
    H = C // reduction

    key = jax.random.PRNGKey(0)
    kx, kw1, kb1, kw2, kb2 = jax.random.split(key, 5)

    x = jax.random.normal(kx, (B, C, L), dtype=jnp.float32)
    # Deterministic synthetic parameters (torch Linear weight layout: (out, in)).
    w1 = jax.random.normal(kw1, (H, C), dtype=jnp.float32) * 0.1
    b1 = jax.random.normal(kb1, (H,), dtype=jnp.float32) * 0.1
    w2 = jax.random.normal(kw2, (C, H), dtype=jnp.float32) * 0.1
    b2 = jax.random.normal(kb2, (C,), dtype=jnp.float32) * 0.1

    # --- fused single-pass path (default for VMEM-sized slabs) ---
    ref = se_block_ref(x, w1, b1, w2, b2)
    out = jax.block_until_ready(se_block(x, w1, b1, w2, b2))
    assert out.shape == (B, C, L)
    assert jnp.allclose(out, ref, atol=1e-5, rtol=1e-5), "fused path mismatch"

    # --- two-pass fallback path, forced small L tile so the lane-resident
    #     accumulator iterates over multiple L tiles ---
    L2 = 256
    x2 = jax.random.normal(kx, (B, C, L2), dtype=jnp.float32)
    ref2 = se_block_ref(x2, w1, b1, w2, b2)
    out2 = jax.block_until_ready(
        se_block(x2, w1, b1, w2, b2, force_two_pass=True,
                 max_block_bytes=C * 128 * 4))
    assert jnp.allclose(out2, ref2, atol=1e-5, rtol=1e-5), "two-pass path mismatch"

    print("KERNEL_OK")
</pallas_src>

<mosaic_0001>
module attributes {stable_mosaic.version = 11 : i64} {
  func.func @_se_fused_kernel(%arg0: i32, %arg1: memref<1x32x16xf32, #tpu.memory_space<vmem>>, %arg2: memref<32x2xf32, #tpu.memory_space<vmem>>, %arg3: memref<1x2xf32, #tpu.memory_space<vmem>>, %arg4: memref<2x32xf32, #tpu.memory_space<vmem>>, %arg5: memref<1x32xf32, #tpu.memory_space<vmem>>, %arg6: memref<1x32x16xf32, #tpu.memory_space<vmem>>) attributes {dimension_semantics = [#tpu.dimension_semantics<parallel>], iteration_bounds = array<i64: 2>, scalar_prefetch = 0 : i64, scratch_operands = 0 : i64, tpu.core_type = #tpu.core_type<tc>, window_params = [{transform_indices = @transform_0, window_bounds = array<i64: 1, 32, 16>}, {pipeline_mode = #tpu.pipeline_mode<synchronous>, transform_indices = @transform_1, window_bounds = array<i64: 32, 2>}, {pipeline_mode = #tpu.pipeline_mode<synchronous>, transform_indices = @transform_2, window_bounds = array<i64: 1, 2>}, {pipeline_mode = #tpu.pipeline_mode<synchronous>, transform_indices = @transform_3, window_bounds = array<i64: 2, 32>}, {pipeline_mode = #tpu.pipeline_mode<synchronous>, transform_indices = @transform_4, window_bounds = array<i64: 1, 32>}, {transform_indices = @transform_5, window_bounds = array<i64: 1, 32, 16>}]} {
    %c0 = arith.constant 0 : index
    %c0_0 = arith.constant 0 : index
    %c0_1 = arith.constant 0 : index
    %0 = vector.load %arg1[%c0, %c0_0, %c0_1] : memref<1x32x16xf32, #tpu.memory_space<vmem>>, vector<1x32x16xf32>
    %cst = arith.constant dense<0.000000e+00> : vector<1x32xf32>
    %1 = vector.multi_reduction <add>, %0, %cst [2] : vector<1x32x16xf32> to vector<1x32xf32>
    %cst_2 = arith.constant 6.250000e-02 : f32
    %2 = vector.broadcast %cst_2 : f32 to vector<1x32xf32>
    %3 = arith.mulf %1, %2 : vector<1x32xf32>
    %c0_3 = arith.constant 0 : index
    %c0_4 = arith.constant 0 : index
    %4 = vector.load %arg2[%c0_3, %c0_4] : memref<32x2xf32, #tpu.memory_space<vmem>>, vector<32x2xf32>
    %cst_5 = arith.constant dense<0.000000e+00> : vector<1x2xf32>
    %5 = tpu.matmul %3, %4, %cst_5 {dimension_numbers = #tpu.dot_dimension_numbers<[1], [0], [0], [1], [0, 0, 1, 1], [], []>} : vector<1x32xf32>, vector<32x2xf32>, vector<1x2xf32> -> vector<1x2xf32>
    %c0_6 = arith.constant 0 : index
    %c0_7 = arith.constant 0 : index
    %6 = vector.load %arg3[%c0_6, %c0_7] : memref<1x2xf32, #tpu.memory_space<vmem>>, vector<1x2xf32>
    %7 = arith.addf %5, %6 : vector<1x2xf32>
    %cst_8 = arith.constant 0.000000e+00 : f32
    %8 = vector.broadcast %cst_8 : f32 to vector<1x2xf32>
    %9 = arith.maximumf %7, %8 : vector<1x2xf32>
    %c0_9 = arith.constant 0 : index
    %c0_10 = arith.constant 0 : index
    %10 = vector.load %arg4[%c0_9, %c0_10] : memref<2x32xf32, #tpu.memory_space<vmem>>, vector<2x32xf32>
    %cst_11 = arith.constant dense<0.000000e+00> : vector<1x32xf32>
    %11 = tpu.matmul %9, %10, %cst_11 {dimension_numbers = #tpu.dot_dimension_numbers<[1], [0], [0], [1], [0, 0, 1, 1], [], []>} : vector<1x2xf32>, vector<2x32xf32>, vector<1x32xf32> -> vector<1x32xf32>
    %c0_12 = arith.constant 0 : index
    %c0_13 = arith.constant 0 : index
    %12 = vector.load %arg5[%c0_12, %c0_13] : memref<1x32xf32, #tpu.memory_space<vmem>>, vector<1x32xf32>
    %13 = arith.addf %11, %12 : vector<1x32xf32>
    %14 = arith.negf %13 : vector<1x32xf32>
    %15 = math.exp %14 : vector<1x32xf32>
    %cst_14 = arith.constant 1.000000e+00 : f32
    %16 = vector.broadcast %cst_14 : f32 to vector<1x32xf32>
    %17 = arith.addf %16, %15 : vector<1x32xf32>
    %18 = arith.divf %16, %17 : vector<1x32xf32>
    %19 = vector.shape_cast %18 : vector<1x32xf32> to vector<1x32x1xf32>
    %20 = vector.broadcast %19 : vector<1x32x1xf32> to vector<1x32x16xf32>
    %21 = arith.mulf %0, %20 : vector<1x32x16xf32>
    %c0_15 = arith.constant 0 : index
    %c0_16 = arith.constant 0 : index
    %c0_17 = arith.constant 0 : index
    %22 = vector.load %arg6[%c0_15, %c0_16, %c0_17] : memref<1x32x16xf32, #tpu.memory_space<vmem>>, vector<1x32x16xf32>
    tpu.vector_store %arg6[%c0_15, %c0_16, %c0_17], %21 {strides = array<i32>} : memref<1x32x16xf32, #tpu.memory_space<vmem>>, vector<1x32x16xf32>,
    return
  }
  func.func @transform_0(%arg0: i32) -> (i32, i32, i32) {
    %c0_i32 = arith.constant 0 : i32
    %c0_i32_0 = arith.constant 0 : i32
    %c0_i32_1 = arith.constant 0 : i32
    return %arg0, %c0_i32, %c0_i32_0 : i32, i32, i32
  }
  func.func @transform_1(%arg0: i32) -> (i32, i32) {
    %c0_i32 = arith.constant 0 : i32
    %c0_i32_0 = arith.constant 0 : i32
    %c0_i32_1 = arith.constant 0 : i32
    return %c0_i32, %c0_i32_0 : i32, i32
  }
  func.func @transform_2(%arg0: i32) -> (i32, i32) {
    %c0_i32 = arith.constant 0 : i32
    %c0_i32_0 = arith.constant 0 : i32
    %c0_i32_1 = arith.constant 0 : i32
    return %c0_i32, %c0_i32_0 : i32, i32
  }
  func.func @transform_3(%arg0: i32) -> (i32, i32) {
    %c0_i32 = arith.constant 0 : i32
    %c0_i32_0 = arith.constant 0 : i32
    %c0_i32_1 = arith.constant 0 : i32
    return %c0_i32, %c0_i32_0 : i32, i32
  }
  func.func @transform_4(%arg0: i32) -> (i32, i32) {
    %c0_i32 = arith.constant 0 : i32
    %c0_i32_0 = arith.constant 0 : i32
    %c0_i32_1 = arith.constant 0 : i32
    return %c0_i32, %c0_i32_0 : i32, i32
  }
  func.func @transform_5(%arg0: i32) -> (i32, i32, i32) {
    %c0_i32 = arith.constant 0 : i32
    %c0_i32_0 = arith.constant 0 : i32
    %c0_i32_1 = arith.constant 0 : i32
    return %arg0, %c0_i32, %c0_i32_0 : i32, i32, i32
  }
}

</mosaic_0001>

<bundles_post_ra>
// kernel: tpu_custom_call.1
= control target key start
LH: loop header
LB: loop body
LE: loop exit
PB: predicated region body
PF: predicated region fallthrough
CT: control target
= control target key end

     0   :  { %s626_s18 = smov 0   ;;  %s695_s0 = inlined_call_operand.vmem [shape: f32[2,32,16], index: 0, kind: input, shape index: {}]   ;;  %s696_s1 = inlined_call_operand.vmem [shape: f32[32,2], index: 1, kind: input, shape index: {}]   ;;  %s697_s2 = inlined_call_operand.vmem [shape: f32[1,2], index: 2, kind: input, shape index: {}]   ;;  %s698_s3 = inlined_call_operand.vmem [shape: f32[2,32], index: 3, kind: input, shape index: {}]   ;;  %s699_s4 = inlined_call_operand.vmem [shape: f32[1,32], index: 4, kind: input, shape index: {}]   ;;  %s700_s5 = inlined_call_operand.vmem [shape: f32[2,32,16], index: 5, kind: output, shape index: {}]  }
   0x1 LB: > { %s524_s19 = sadd.s32 4294967295, %s591_s18   ;;  %p528_p0 = scmp.ge.s32.totalorder %s591_s18, 1  ;;  %s591_s18 = sphi %s626_s18, %s15_s18  }
   0x2   : > { %p187_p1 = scmp.lt.s32.totalorder %s591_s18, 3 }
   0x4   : > { %p188_p2 = pnand %p528_p0, %p187_p1 }
   0x5   : > { %p215_p3 = scmp.lt.s32.totalorder (!%p188_p2), %s524_s19, 1  ;;  %vm229_vm0 = vcmask (!%p188_p2), 130048   ;;  %v246_v8 = vld [vmem:[%s696_s1] sm:$0xff] (!%p188_p2)  ;;  %v247_v9 = vld [vmem:[%s696_s1 + $0x8] sm:$0xff] (!%p188_p2)  ;;  %v593_v10 = vmov (!%p188_p2), 0.0|0.0   ;;  %v248_v12 = vld [vmem:[%s696_s1 + $0x10] sm:$0xff] (!%p188_p2)  ;;  %v255_v16 = vlaneseq (!%p188_p2) }
   0x6   : > { %191 = sbr.rel (%p188_p2) target bundleno = 755 (0x2f3), region = 40  ;;  %564 = vmatprep.subr.bf16.mxu0 (!%p188_p2), %v593_v10  ;;  %v565_v11 = vpack.c.bf16 (!%p188_p2), %v247_v9, %v246_v8  ;;  %v249_v13 = vld [vmem:[%s696_s1 + $0x18] sm:$0xff] (!%p188_p2)  ;;  %vm594_vm1 = vmmov (!%p188_p2), 0   ;;  %v595_v15 = vmov (!%p188_p2), 0.0   ;;  %vm266_vm2 = vcmask (!%p188_p2), 130112  }
   0x7   : > { %v568_v14 = vpack.c.bf16 (!%p188_p2), %v249_v13, %v248_v12  ;;  %556 = vmatprep.mubr.msk.f32.mxu0 (!%p188_p2), %vm594_vm1, %v595_v15  ;;  %559 = vmatprep.subr.mxu1 (!%p188_p2), %v595_v15  ;;  %v256_v17 = vand.u32 (!%p188_p2), 127, %v255_v16  ;;  %v258_v18 = vshrl.u32 (!%p188_p2), %v255_v16, 7  ;;  %vm273_vm3 = vcmask (!%p188_p2), 195712   ;;  %v356_v41 = vld [vmem:[%s698_s3] sm:$0x3] (!%p188_p2) }
   0x8   : > { %566 = vmatpush3.bf16.msra.mxu0 (!%p188_p2), %v565_v11  ;;  %561 = vmatprep.mubr.msk.f32.mxu1 (!%p188_p2), %vm594_vm1, %v595_v15  ;;  %vm280_vm4 = vcmask (!%p188_p2), 261312   ;;  %vm282_vm5 = vcmask (!%p188_p2), 261120   ;;  %vm362_vm6 = vcmask (!%p188_p2), 1041408   ;;  %v250_v42 = vld [vmem:[%s697_s2] sm:$0x1] (!%p188_p2)  ;;  %vm358_vm7 = vcmask (!%p188_p2), 15360  }
   0x9   : > { %567 = vmatprep.subr.bf16.mxu0 (!%p188_p2), %v593_v10  ;;  %v261_v19 = vadd.s32 (!%p188_p2), 4294967288, %v256_v17  ;;  %v275_v20 = vadd.s32 (!%p188_p2), 4294967272, %v256_v17  ;;  %v268_v22 = vadd.s32 (!%p188_p2), 4294967280, %v256_v17  ;;  %v259_v24 = vsub.s32 (!%p188_p2), %v256_v17, %v258_v18  ;;  %560 = vmatpush3.msk.msra.mxu1 (!%p188_p2), %vm362_vm6, %v356_v41  ;;  %v357_v47 = vld [vmem:[%s699_s4] sm:$0x1] (!%p188_p2) }
   0xa   : > { %v444_v54 = vsub.s32 (!%p188_p2), 0, %v258_v18 }
   0xb   : > { %v264_v26 = vsub.s32 (!%p188_p2), %v261_v19, %v258_v18  ;;  %v278_v27 = vsub.s32 (!%p188_p2), %v275_v20, %v258_v18  ;;  %v271_v28 = vsub.s32 (!%p188_p2), %v268_v22, %v258_v18 }
   0xc   : > { %569 = vmatpush3.bf16.msra.mxu0 (!%p188_p2), %v568_v14 }
   0xd   : > { %s702_s19 = smov (!%p215_p3, %s524_s19), 1 }
   0xe   : > { %s539_s20 = sshll.u32 %s702_s19, 5 }
   0xf   : > { %s219_s23 = scalar_lea.vmem %s695_s0, %s539_s20  ;;  %s224_s15 = scalar_lea.vmem %s700_s5, %s539_s20 }
  0x10   : > { %v642_v0 = vld [vmem:[%s219_s23] sm:$0xff]  ;;  %v644_v1 = vld [vmem:[%s219_s23 + $0x10] sm:$0xff]  ;;  %v646_v2 = vld [vmem:[%s219_s23 + $0x8] sm:$0xff] }
  0x11   : > { %v230_v3 = vsel %vm229_vm0, %v642_v0, 0.0  ;;  %v236_v4 = vsel %vm229_vm0, %v644_v1, 0.0  ;;  %v652_v5 = vld [vmem:[%s219_s23 + $0x18] sm:$0xff]  ;;  %v233_v6 = vsel %vm229_vm0, %v646_v2, 0.0 }
  0x12   : > { %231 = vadd.xlane.f32.xlu0 %v230_v3  ;;  %237 = vadd.xlane.f32.xlu1 %v236_v4  ;;  %v239_v7 = vsel %vm229_vm0, %v652_v5, 0.0 }
  0x16   : > { %234 = vadd.xlane.f32.xlu0 %v233_v6  ;;  %240 = vadd.xlane.f32.xlu1 %v239_v7 }
  0x9f   : > { %v232_v21 = vpop.xlane.xlu0 %231  ;;  %v238_v23 = vpop.xlane.xlu1 %237 }
  0xa0   : > { %v242_v25 = vmul.f32 0.0625, %v232_v21  ;;  %v244_v29 = vmul.f32 0.0625, %v238_v23 }
  0xa2   : > { %v260_v34 = vrot.slane %v242_v25, %v259_v24  ;;  %v272_v37 = vrot.slane %v244_v29, %v271_v28 }
  0xa3   : > { %v235_v30 = vpop.xlane.xlu0 %234  ;;  %v241_v31 = vpop.xlane.xlu1 %240 }
  0xa4   : > { %v243_v32 = vmul.f32 0.0625, %v235_v30  ;;  %v245_v33 = vmul.f32 0.0625, %v241_v31 }
  0xa6   : > { %v265_v35 = vrot.slane %v243_v32, %v264_v26  ;;  %v279_v36 = vrot.slane %v245_v33, %v278_v27 }
  0xa8   : > { %v267_v38 = vsel %vm266_vm2, %v265_v35, %v260_v34 }
  0xa9   : > { %v274_v39 = vsel %vm273_vm3, %v272_v37, %v267_v38 }
  0xaa   : > { %v281_v40 = vsel %vm280_vm4, %v279_v36, %v274_v39 }
  0xab   : > { %557 = vmatmul.mubr.msk.f32.vlgmr.msra.gmra.mrb[0].mxu0 %vm282_vm5, %v281_v40 }
 0x17e   : > { %v351_v43 = vpop.f32.mrb[0].mxu0 }
 0x17f   : > { %v352_v44 = vadd.f32 %v351_v43, %v250_v42  ;;  %v558_v45 = vpop.f32.mrb[1].mxu0 }
 0x181   : > { %v355_v46 = vmax.f32 %v352_v44, 0.0 }
 0x183   : > { %562 = vmatmul.mubr.msk.f32.vlgmr.msra.gmra.mrb[0].mxu1 %vm358_vm7, %v355_v46 }
 0x256   : > { %v432_v48 = vpop.f32.mrb[0].mxu1 }
 0x257   : > { %v433_v49 = vadd.f32 %v432_v48, %v357_v47  ;;  %v563_v50 = vpop.f32.mrb[1].mxu1 }
 0x259   : > { %v536_v51 = vmul.f32 -1.442695, %v433_v49 }
 0x25b   : > { %581 = vpow2.f32 %v536_v51 }
 0x265   : > { %v582_v52 = vpop.eup %581 }
 0x266   : > { %v439_v53 = vadd.f32 1.0, %v582_v52 }
 0x268   : > { %583 = vrcp.f32 %v439_v53 }
 0x272   : > { %v584_v55 = vpop.eup %583 }
 0x273   : > { %v445_v56 = vrot.slane %v584_v55, %v444_v54 }
 0x275   : > { %451 = vbcast.lane.b32.xlu1 %v445_v56, 264  ;;  %447 = vbcast.lane.b32.xlu0 %v445_v56, 256 }
 0x279   : > { %455 = vbcast.lane.b32.xlu1 %v445_v56, 272 }
 0x27d   : > { %459 = vbcast.lane.b32.xlu1 %v445_v56, 280 }
 0x2e7   : > { %v452_v57 = vpop.permute.xlu1 %451  ;;  %v448_v58 = vpop.permute.xlu0 %447 }
 0x2e8   : > { %v462_v59 = vmul.f32 %v452_v57, %v646_v2  ;;  %v461_v60 = vmul.f32 %v448_v58, %v642_v0 }
 0x2ea   : > { %466 = vst.msk [vmem:[%s224_s15 + $0x8] sm:$0xff] %vm229_vm0, %v462_v59  ;;  %465 = vst.msk [vmem:[%s224_s15] sm:$0xff] %vm229_vm0, %v461_v60 }
 0x2eb   : > { %v456_v61 = vpop.permute.xlu1 %455 }
 0x2ec   : > { %v463_v62 = vmul.f32 %v456_v61, %v644_v1 }
 0x2ee   : > { %467 = vst.msk [vmem:[%s224_s15 + $0x10] sm:$0xff] %vm229_vm0, %v463_v62 }
 0x2ef   : > { %v460_v63 = vpop.permute.xlu1 %459 }
 0x2f0   : > { %v464_v3 = vmul.f32 %v460_v63, %v652_v5 }
 0x2f2   : > { %468 = vst.msk [vmem:[%s224_s15 + $0x18] sm:$0xff] %vm229_vm0, %v464_v3 }
 0x2f3 PF: > { %s15_s18 = sadd.s32 1, %s591_s18  }
 0x2f4   : > { %p12_p4 = scmp.ge.s32.totalorder %s15_s18, 4  }
 0x2f6   :  { %14 = sbr.rel (!%p12_p4) target bundleno = 1 (0x1), region = 70 }

</bundles_post_ra>
